<compile_context>
chip_gen: v6e
topology: v6e:2x2x1
jax: 0.10.0
libtpu: 0.0.40
codegen_flags: <defaults>
</compile_context>

<pallas_src>
import functools

import jax
import jax.numpy as jnp
from jax.experimental import pallas as pl
from jax.experimental.pallas import tpu as pltpu


def _round_up(x, m):
    return ((x + m - 1) // m) * m


def _cdiv(a, b):
    return (a + b - 1) // b


@functools.lru_cache(maxsize=None)
def _vmem_limit_bytes():
    """Per-generation VMEM budget: ~75% of physical, capped at 96 MiB."""
    try:
        cap = int(pltpu.get_tpu_info().vmem_capacity_bytes)
    except Exception:
        cap = 0
    if cap < 32 * 1024 * 1024:           # query unavailable / implausible
        cap = 64 * 1024 * 1024           # conservative fallback (v7x physical)
    return int(min(cap * 3 // 4, 96 * 1024 * 1024))


# ---------------------------------------------------------------------------
# Pallas kernels
# ---------------------------------------------------------------------------

def _conv3x3_relu_kernel(x_ref, h_ref, w_ref, b_ref, o_ref, xcat_ref, *,
                         offsets):
    """3x3 'same' conv + bias + ReLU for one (image, row-tile) grid step.

    x_ref   : (1, TM, Cin)     bf16  main tile of the padded, flattened image
    h_ref   : (1, HALO, Cin)   bf16  halo rows just past the main tile
    w_ref   : (9, Cin, Cout)   bf16  tap t = ky*3 + kx weights (VMEM resident)
    b_ref   : (1, Cout)        f32
    o_ref   : (1, TM, Cout)    bf16  extended output rows y*Wp + x (rows with
                                     x >= W are don't-care, wrapper discards)
    xcat_ref: (TM+HALO, Cin)   bf16  VMEM scratch: main tile + halo, contiguous
    """
    tm = x_ref.shape[1]
    halo = h_ref.shape[1]

    # Stitch main tile + halo so every tap window is one contiguous slice.
    xcat_ref[pl.ds(0, tm), :] = x_ref[0]
    xcat_ref[pl.ds(tm, halo), :] = h_ref[0]

    def tap(t):
        xt = xcat_ref[pl.ds(offsets[t], tm), :]          # (TM, Cin) bf16
        return jnp.dot(xt, w_ref[t], preferred_element_type=jnp.float32)

    acc = tap(0)
    for t in range(1, 9):            # statically unrolled: 9 MXU matmuls
        acc = acc + tap(t)

    o_ref[0] = jnp.maximum(acc + b_ref[...], 0.0).astype(o_ref.dtype)


def _maxpool2x2_kernel(x_ref, o_ref):
    """2x2 / stride-2 max pool for one image (bf16 in, bf16 out).

    x_ref: (1, Ho, 2, Wo, 2*C) -- free (layout-preserving) host reshape of the
                                  (H, W, C) image: dim 2 = pooling-window row,
                                  last dim packs the two window columns.
    o_ref: (1, Ho, Wo, C)
    """
    c = o_ref.shape[-1]
    rows = jnp.maximum(x_ref[0, :, 0], x_ref[0, :, 1])       # (Ho, Wo, 2C)
    o_ref[0] = jnp.maximum(rows[..., :c], rows[..., c:])     # (Ho, Wo, C)


# ---------------------------------------------------------------------------
# Wrappers (padding / flattening / tiling decisions / weight re-layout)
# ---------------------------------------------------------------------------

def conv3x3_relu(x, w, b, *, tile_rows=None):
    """x: (N,H,W,Cin) NHWC (f32 or bf16); w: (Cout,Cin,3,3) OIHW; b: (Cout,).

    Returns (N,H,W,Cout) bf16.
    """
    N, H, W, Cin = x.shape
    Cout = w.shape[0]

    Wp = _round_up(W + 2, 8)             # padded width, sublane-aligned taps
    M = H * Wp                           # valid extended output rows (8-align)
    halo = _round_up(2 * Wp + 2, 8)      # deepest tap reach, 8-aligned

    # Row-tile target scales ~1/C so per-step VMEM stays a few MB.
    if tile_rows is None:
        tile_rows = max(1024, (1 << 20) // max(Cin, Cout))

    # TM must be a multiple of `halo` so the halo block index is an integer;
    # shrink it so the tiles just cover M (minimal padded overshoot).
    k_target = max(1, tile_rows // halo)
    nt = _cdiv(M, k_target * halo)
    k = _cdiv(_cdiv(M, nt), halo)
    tm = k * halo
    nt = _cdiv(M, tm)
    l_out = nt * tm                      # extended rows actually computed
    l_in = l_out + halo                  # input rows that may be read
    k_halo = tm // halo

    # Zero-pad once (top/left = 1 for the 'same' conv; extra right/bottom
    # zeros only feed don't-care rows), cast to bf16, flatten spatially.
    hp = max(_cdiv(l_in, Wp), H + 2)
    xf = jnp.pad(x.astype(jnp.bfloat16),
                 ((0, 0), (1, hp - H - 1), (1, Wp - W - 1), (0, 0)))
    xf = xf.reshape(N, hp * Wp, Cin)

    # (Cout,Cin,3,3) -> (9,Cin,Cout) bf16, tap order t = ky*3 + kx.
    w9 = jnp.transpose(w, (2, 3, 1, 0)).reshape(9, Cin, Cout).astype(jnp.bfloat16)
    b2 = b.reshape(1, Cout).astype(jnp.float32)

    offsets = tuple(ky * Wp + kx for ky in range(3) for kx in range(3))

    out = pl.pallas_call(
        functools.partial(_conv3x3_relu_kernel, offsets=offsets),
        out_shape=jax.ShapeDtypeStruct((N, l_out, Cout), jnp.bfloat16),
        grid_spec=pltpu.PrefetchScalarGridSpec(
            num_scalar_prefetch=0,
            grid=(N, nt),
            in_specs=[
                # main row tile
                pl.BlockSpec((1, tm, Cin), lambda n, m: (n, m, 0)),
                # halo rows immediately past the main tile (same array)
                pl.BlockSpec((1, halo, Cin),
                             lambda n, m: (n, (m + 1) * k_halo, 0)),
                # weights + bias: constant index -> fetched once, resident
                pl.BlockSpec((9, Cin, Cout), lambda n, m: (0, 0, 0)),
                pl.BlockSpec((1, Cout), lambda n, m: (0, 0)),
            ],
            out_specs=pl.BlockSpec((1, tm, Cout), lambda n, m: (n, m, 0)),
            scratch_shapes=[pltpu.VMEM((tm + halo, Cin), jnp.bfloat16)],
        ),
        compiler_params=pltpu.CompilerParams(
            dimension_semantics=("parallel", "parallel"),
            vmem_limit_bytes=_vmem_limit_bytes(),
        ),
    )(xf, xf, w9, b2)

    # Valid outputs live at extended rows y*Wp + x with x < W.
    return out[:, :M, :].reshape(N, H, Wp, Cout)[:, :, :W, :]


def maxpool2x2(x):
    """x: (N,H,W,C) NHWC -> (N,H//2,W//2,C); 2x2 window, stride 2."""
    N, H, W, C = x.shape
    Ho, Wo = H // 2, W // 2
    xr = x.reshape(N, Ho, 2, Wo, 2 * C)           # free reshape, no transpose
    return pl.pallas_call(
        _maxpool2x2_kernel,
        out_shape=jax.ShapeDtypeStruct((N, Ho, Wo, C), x.dtype),
        grid_spec=pltpu.PrefetchScalarGridSpec(
            num_scalar_prefetch=0,
            grid=(N,),
            in_specs=[pl.BlockSpec((1, Ho, 2, Wo, 2 * C),
                                   lambda n: (n, 0, 0, 0, 0))],
            out_specs=pl.BlockSpec((1, Ho, Wo, C), lambda n: (n, 0, 0, 0)),
        ),
        compiler_params=pltpu.CompilerParams(
            dimension_semantics=("parallel",),
            vmem_limit_bytes=_vmem_limit_bytes(),
        ),
    )(xr)


# ---------------------------------------------------------------------------
# VGG19 encoder (features[:4], [4:9], [9:18], [18:27], [27:36])
# ---------------------------------------------------------------------------

# (has_leading_maxpool, [(Cin, Cout), ...]) per stage
_VGG19_STAGES = [
    (False, [(3, 64), (64, 64)]),
    (True,  [(64, 128), (128, 128)]),
    (True,  [(128, 256), (256, 256), (256, 256), (256, 256)]),
    (True,  [(256, 512), (512, 512), (512, 512), (512, 512)]),
    (True,  [(512, 512), (512, 512), (512, 512), (512, 512)]),
]


def init_vgg19_params(key):
    params = []
    for _, convs in _VGG19_STAGES:
        stage = []
        for cin, cout in convs:
            key, kw, kb = jax.random.split(key, 3)
            fan_in = cin * 9
            w = jax.random.normal(kw, (cout, cin, 3, 3), jnp.float32) \
                * jnp.sqrt(2.0 / fan_in)
            b = jax.random.normal(kb, (cout,), jnp.float32) * 0.01
            stage.append((w, b))
        params.append(stage)
    return params


def encoder_vgg_forward(x_nchw, params):
    """Matches encoder_vgg.forward: returns (x5, [x4, x3, x2, x1]) in NCHW."""
    x = jnp.transpose(x_nchw, (0, 2, 3, 1))   # NCHW -> NHWC (kernel layout)
    feats = []
    for (has_pool, _), stage_params in zip(_VGG19_STAGES, params):
        if has_pool:
            x = maxpool2x2(x)
        for w, b in stage_params:
            x = conv3x3_relu(w=w, b=b, x=x)
        feats.append(x)
    x1, x2, x3, x4, x5 = [
        jnp.transpose(f, (0, 3, 1, 2)).astype(jnp.float32) for f in feats]
    return x5, [x4, x3, x2, x1]


# ---------------------------------------------------------------------------
# Pure-XLA reference (for numerical validation of the Pallas kernels)
# ---------------------------------------------------------------------------

def _conv_ref_nhwc(x, w, b):
    y = jax.lax.conv_general_dilated(
        x, jnp.transpose(w, (2, 3, 1, 0)),
        window_strides=(1, 1), padding="SAME",
        dimension_numbers=("NHWC", "HWIO", "NHWC"),
        precision=jax.lax.Precision.HIGHEST)
    return jnp.maximum(y + b, 0.0)


def _reference_forward(x_nchw, params):
    x = jnp.transpose(x_nchw, (0, 2, 3, 1))
    feats = []
    for (has_pool, _), stage_params in zip(_VGG19_STAGES, params):
        if has_pool:
            n, h, w_, c = x.shape
            x = x.reshape(n, h // 2, 2, w_ // 2, 2, c).max(axis=(2, 4))
        for w, b in stage_params:
            x = _conv_ref_nhwc(x, w, b)
        feats.append(x)
    x1, x2, x3, x4, x5 = [jnp.transpose(f, (0, 3, 1, 2)) for f in feats]
    return x5, [x4, x3, x2, x1]


# ---------------------------------------------------------------------------

if __name__ == "__main__":
    key = jax.random.PRNGKey(0)
    kx, kp, k1, k2, k3 = jax.random.split(key, 5)

    # --- focused check: multi-row-tile conv path (forced small tiles) -------
    xs = jax.random.normal(k1, (1, 12, 12, 16), jnp.float32)
    ws = jax.random.normal(k2, (32, 16, 3, 3), jnp.float32) * 0.2
    bs = jax.random.normal(k3, (32,), jnp.float32) * 0.1
    got_s = jax.jit(lambda a, b_, c: conv3x3_relu(a, b_, c, tile_rows=64))(
        xs, ws, bs)
    got_s = jax.block_until_ready(got_s).astype(jnp.float32)
    ref_s = jax.jit(_conv_ref_nhwc)(xs, ws, bs)
    err_s = float(jnp.max(jnp.abs(got_s - ref_s)) /
                  (jnp.max(jnp.abs(ref_s)) + 1e-6))
    assert err_s < 0.05, err_s

    # --- full encoder (small RGB input, NCHW, PyTorch-style) ----------------
    x = jax.random.normal(kx, (2, 3, 32, 32), jnp.float32)
    params = init_vgg19_params(kp)

    fwd = jax.jit(encoder_vgg_forward)
    x5, skips = fwd(x, params)
    x5 = jax.block_until_ready(x5)
    skips = [jax.block_until_ready(s) for s in skips]

    assert x5.shape == (2, 512, 2, 2), x5.shape
    assert [tuple(s.shape) for s in skips] == [
        (2, 512, 4, 4), (2, 256, 8, 8), (2, 128, 16, 16), (2, 64, 32, 32)
    ], [s.shape for s in skips]

    # Numerical check vs. pure-XLA reference (bf16 activations -> loose bound).
    r5, rskips = jax.jit(_reference_forward)(x, params)
    for got, ref in zip([x5] + skips, [r5] + rskips):
        err = float(jnp.max(jnp.abs(got - ref)) / (jnp.max(jnp.abs(ref)) + 1e-6))
        assert err < 0.1, err

    print("KERNEL_OK")
</pallas_src>

<mosaic_0001>
module attributes {stable_mosaic.version = 11 : i64} {
  func.func @_conv3x3_relu_kernel(%arg0: i32, %arg1: i32, %arg2: memref<1x40x16xbf16, #tpu.memory_space<vmem>>, %arg3: memref<1x40x16xbf16, #tpu.memory_space<vmem>>, %arg4: memref<9x16x32xbf16, #tpu.memory_space<vmem>>, %arg5: memref<1x32xf32, #tpu.memory_space<vmem>>, %arg6: memref<1x40x32xbf16, #tpu.memory_space<vmem>>, %arg7: memref<80x16xbf16, #tpu.memory_space<vmem>>) attributes {dimension_semantics = [#tpu.dimension_semantics<parallel>, #tpu.dimension_semantics<parallel>], iteration_bounds = array<i64: 1, 5>, scalar_prefetch = 0 : i64, scratch_operands = 1 : i64, tpu.core_type = #tpu.core_type<tc>, window_params = [{transform_indices = @transform_0, window_bounds = array<i64: 1, 40, 16>}, {transform_indices = @transform_1, window_bounds = array<i64: 1, 40, 16>}, {pipeline_mode = #tpu.pipeline_mode<synchronous>, transform_indices = @transform_2, window_bounds = array<i64: 9, 16, 32>}, {pipeline_mode = #tpu.pipeline_mode<synchronous>, transform_indices = @transform_3, window_bounds = array<i64: 1, 32>}, {transform_indices = @transform_4, window_bounds = array<i64: 1, 40, 32>}]} {
    %c0 = arith.constant 0 : index
    %c0_0 = arith.constant 0 : index
    %c0_1 = arith.constant 0 : index
    %0 = vector.load %arg2[%c0, %c0_0, %c0_1] : memref<1x40x16xbf16, #tpu.memory_space<vmem>>, vector<1x40x16xbf16>
    %1 = vector.shape_cast %0 : vector<1x40x16xbf16> to vector<40x16xbf16>
    %c0_2 = arith.constant 0 : index
    %c0_3 = arith.constant 0 : index
    %2 = vector.load %arg7[%c0_2, %c0_3] : memref<80x16xbf16, #tpu.memory_space<vmem>>, vector<40x16xbf16>
    tpu.vector_store %arg7[%c0_2, %c0_3], %1 {strides = array<i32>} : memref<80x16xbf16, #tpu.memory_space<vmem>>, vector<40x16xbf16>,
    %c0_4 = arith.constant 0 : index
    %c0_5 = arith.constant 0 : index
    %c0_6 = arith.constant 0 : index
    %3 = vector.load %arg3[%c0_4, %c0_5, %c0_6] : memref<1x40x16xbf16, #tpu.memory_space<vmem>>, vector<1x40x16xbf16>
    %4 = vector.shape_cast %3 : vector<1x40x16xbf16> to vector<40x16xbf16>
    %c40 = arith.constant 40 : index
    %c0_7 = arith.constant 0 : index
    %5 = vector.load %arg7[%c40, %c0_7] : memref<80x16xbf16, #tpu.memory_space<vmem>>, vector<40x16xbf16>
    tpu.vector_store %arg7[%c40, %c0_7], %4 {strides = array<i32>} : memref<80x16xbf16, #tpu.memory_space<vmem>>, vector<40x16xbf16>,
    %c0_8 = arith.constant 0 : index
    %c0_9 = arith.constant 0 : index
    %6 = vector.load %arg7[%c0_8, %c0_9] : memref<80x16xbf16, #tpu.memory_space<vmem>>, vector<40x16xbf16>
    %c0_10 = arith.constant 0 : index
    %c0_11 = arith.constant 0 : index
    %c0_12 = arith.constant 0 : index
    %7 = vector.load %arg4[%c0_10, %c0_11, %c0_12] : memref<9x16x32xbf16, #tpu.memory_space<vmem>>, vector<1x16x32xbf16>
    %8 = vector.shape_cast %7 : vector<1x16x32xbf16> to vector<16x32xbf16>
    %cst = arith.constant dense<0.000000e+00> : vector<40x32xf32>
    %9 = tpu.matmul %6, %8, %cst {dimension_numbers = #tpu.dot_dimension_numbers<[1], [0], [0], [1], [0, 0, 1, 1], [], []>} : vector<40x16xbf16>, vector<16x32xbf16>, vector<40x32xf32> -> vector<40x32xf32>
    %c1 = arith.constant 1 : index
    %c0_13 = arith.constant 0 : index
    %10 = vector.load %arg7[%c1, %c0_13] : memref<80x16xbf16, #tpu.memory_space<vmem>>, vector<40x16xbf16>
    %c1_14 = arith.constant 1 : index
    %c0_15 = arith.constant 0 : index
    %c0_16 = arith.constant 0 : index
    %11 = vector.load %arg4[%c1_14, %c0_15, %c0_16] : memref<9x16x32xbf16, #tpu.memory_space<vmem>>, vector<1x16x32xbf16>
    %12 = vector.shape_cast %11 : vector<1x16x32xbf16> to vector<16x32xbf16>
    %cst_17 = arith.constant dense<0.000000e+00> : vector<40x32xf32>
    %13 = tpu.matmul %10, %12, %cst_17 {dimension_numbers = #tpu.dot_dimension_numbers<[1], [0], [0], [1], [0, 0, 1, 1], [], []>} : vector<40x16xbf16>, vector<16x32xbf16>, vector<40x32xf32> -> vector<40x32xf32>
    %14 = arith.addf %9, %13 : vector<40x32xf32>
    %c2 = arith.constant 2 : index
    %c0_18 = arith.constant 0 : index
    %15 = vector.load %arg7[%c2, %c0_18] : memref<80x16xbf16, #tpu.memory_space<vmem>>, vector<40x16xbf16>
    %c2_19 = arith.constant 2 : index
    %c0_20 = arith.constant 0 : index
    %c0_21 = arith.constant 0 : index
    %16 = vector.load %arg4[%c2_19, %c0_20, %c0_21] : memref<9x16x32xbf16, #tpu.memory_space<vmem>>, vector<1x16x32xbf16>
    %17 = vector.shape_cast %16 : vector<1x16x32xbf16> to vector<16x32xbf16>
    %cst_22 = arith.constant dense<0.000000e+00> : vector<40x32xf32>
    %18 = tpu.matmul %15, %17, %cst_22 {dimension_numbers = #tpu.dot_dimension_numbers<[1], [0], [0], [1], [0, 0, 1, 1], [], []>} : vector<40x16xbf16>, vector<16x32xbf16>, vector<40x32xf32> -> vector<40x32xf32>
    %19 = arith.addf %14, %18 : vector<40x32xf32>
    %c16 = arith.constant 16 : index
    %c0_23 = arith.constant 0 : index
    %20 = vector.load %arg7[%c16, %c0_23] : memref<80x16xbf16, #tpu.memory_space<vmem>>, vector<40x16xbf16>
    %c3 = arith.constant 3 : index
    %c0_24 = arith.constant 0 : index
    %c0_25 = arith.constant 0 : index
    %21 = vector.load %arg4[%c3, %c0_24, %c0_25] : memref<9x16x32xbf16, #tpu.memory_space<vmem>>, vector<1x16x32xbf16>
    %22 = vector.shape_cast %21 : vector<1x16x32xbf16> to vector<16x32xbf16>
    %cst_26 = arith.constant dense<0.000000e+00> : vector<40x32xf32>
    %23 = tpu.matmul %20, %22, %cst_26 {dimension_numbers = #tpu.dot_dimension_numbers<[1], [0], [0], [1], [0, 0, 1, 1], [], []>} : vector<40x16xbf16>, vector<16x32xbf16>, vector<40x32xf32> -> vector<40x32xf32>
    %24 = arith.addf %19, %23 : vector<40x32xf32>
    %c17 = arith.constant 17 : index
    %c0_27 = arith.constant 0 : index
    %25 = vector.load %arg7[%c17, %c0_27] : memref<80x16xbf16, #tpu.memory_space<vmem>>, vector<40x16xbf16>
    %c4 = arith.constant 4 : index
    %c0_28 = arith.constant 0 : index
    %c0_29 = arith.constant 0 : index
    %26 = vector.load %arg4[%c4, %c0_28, %c0_29] : memref<9x16x32xbf16, #tpu.memory_space<vmem>>, vector<1x16x32xbf16>
    %27 = vector.shape_cast %26 : vector<1x16x32xbf16> to vector<16x32xbf16>
    %cst_30 = arith.constant dense<0.000000e+00> : vector<40x32xf32>
    %28 = tpu.matmul %25, %27, %cst_30 {dimension_numbers = #tpu.dot_dimension_numbers<[1], [0], [0], [1], [0, 0, 1, 1], [], []>} : vector<40x16xbf16>, vector<16x32xbf16>, vector<40x32xf32> -> vector<40x32xf32>
    %29 = arith.addf %24, %28 : vector<40x32xf32>
    %c18 = arith.constant 18 : index
    %c0_31 = arith.constant 0 : index
    %30 = vector.load %arg7[%c18, %c0_31] : memref<80x16xbf16, #tpu.memory_space<vmem>>, vector<40x16xbf16>
    %c5 = arith.constant 5 : index
    %c0_32 = arith.constant 0 : index
    %c0_33 = arith.constant 0 : index
    %31 = vector.load %arg4[%c5, %c0_32, %c0_33] : memref<9x16x32xbf16, #tpu.memory_space<vmem>>, vector<1x16x32xbf16>
    %32 = vector.shape_cast %31 : vector<1x16x32xbf16> to vector<16x32xbf16>
    %cst_34 = arith.constant dense<0.000000e+00> : vector<40x32xf32>
    %33 = tpu.matmul %30, %32, %cst_34 {dimension_numbers = #tpu.dot_dimension_numbers<[1], [0], [0], [1], [0, 0, 1, 1], [], []>} : vector<40x16xbf16>, vector<16x32xbf16>, vector<40x32xf32> -> vector<40x32xf32>
    %34 = arith.addf %29, %33 : vector<40x32xf32>
    %c32 = arith.constant 32 : index
    %c0_35 = arith.constant 0 : index
    %35 = vector.load %arg7[%c32, %c0_35] : memref<80x16xbf16, #tpu.memory_space<vmem>>, vector<40x16xbf16>
    %c6 = arith.constant 6 : index
    %c0_36 = arith.constant 0 : index
    %c0_37 = arith.constant 0 : index
    %36 = vector.load %arg4[%c6, %c0_36, %c0_37] : memref<9x16x32xbf16, #tpu.memory_space<vmem>>, vector<1x16x32xbf16>
    %37 = vector.shape_cast %36 : vector<1x16x32xbf16> to vector<16x32xbf16>
    %cst_38 = arith.constant dense<0.000000e+00> : vector<40x32xf32>
    %38 = tpu.matmul %35, %37, %cst_38 {dimension_numbers = #tpu.dot_dimension_numbers<[1], [0], [0], [1], [0, 0, 1, 1], [], []>} : vector<40x16xbf16>, vector<16x32xbf16>, vector<40x32xf32> -> vector<40x32xf32>
    %39 = arith.addf %34, %38 : vector<40x32xf32>
    %c33 = arith.constant 33 : index
    %c0_39 = arith.constant 0 : index
    %40 = vector.load %arg7[%c33, %c0_39] : memref<80x16xbf16, #tpu.memory_space<vmem>>, vector<40x16xbf16>
    %c7 = arith.constant 7 : index
    %c0_40 = arith.constant 0 : index
    %c0_41 = arith.constant 0 : index
    %41 = vector.load %arg4[%c7, %c0_40, %c0_41] : memref<9x16x32xbf16, #tpu.memory_space<vmem>>, vector<1x16x32xbf16>
    %42 = vector.shape_cast %41 : vector<1x16x32xbf16> to vector<16x32xbf16>
    %cst_42 = arith.constant dense<0.000000e+00> : vector<40x32xf32>
    %43 = tpu.matmul %40, %42, %cst_42 {dimension_numbers = #tpu.dot_dimension_numbers<[1], [0], [0], [1], [0, 0, 1, 1], [], []>} : vector<40x16xbf16>, vector<16x32xbf16>, vector<40x32xf32> -> vector<40x32xf32>
    %44 = arith.addf %39, %43 : vector<40x32xf32>
    %c34 = arith.constant 34 : index
    %c0_43 = arith.constant 0 : index
    %45 = vector.load %arg7[%c34, %c0_43] : memref<80x16xbf16, #tpu.memory_space<vmem>>, vector<40x16xbf16>
    %c8 = arith.constant 8 : index
    %c0_44 = arith.constant 0 : index
    %c0_45 = arith.constant 0 : index
    %46 = vector.load %arg4[%c8, %c0_44, %c0_45] : memref<9x16x32xbf16, #tpu.memory_space<vmem>>, vector<1x16x32xbf16>
    %47 = vector.shape_cast %46 : vector<1x16x32xbf16> to vector<16x32xbf16>
    %cst_46 = arith.constant dense<0.000000e+00> : vector<40x32xf32>
    %48 = tpu.matmul %45, %47, %cst_46 {dimension_numbers = #tpu.dot_dimension_numbers<[1], [0], [0], [1], [0, 0, 1, 1], [], []>} : vector<40x16xbf16>, vector<16x32xbf16>, vector<40x32xf32> -> vector<40x32xf32>
    %49 = arith.addf %44, %48 : vector<40x32xf32>
    %c0_47 = arith.constant 0 : index
    %c0_48 = arith.constant 0 : index
    %50 = vector.load %arg5[%c0_47, %c0_48] : memref<1x32xf32, #tpu.memory_space<vmem>>, vector<1x32xf32>
    %51 = vector.broadcast %50 : vector<1x32xf32> to vector<40x32xf32>
    %52 = arith.addf %49, %51 : vector<40x32xf32>
    %cst_49 = arith.constant 0.000000e+00 : f32
    %53 = vector.broadcast %cst_49 : f32 to vector<40x32xf32>
    %54 = arith.maximumf %52, %53 : vector<40x32xf32>
    %55 = arith.truncf %54 : vector<40x32xf32> to vector<40x32xbf16>
    %c0_50 = arith.constant 0 : index
    %c0_51 = arith.constant 0 : index
    %c0_52 = arith.constant 0 : index
    %56 = vector.load %arg6[%c0_50, %c0_51, %c0_52] : memref<1x40x32xbf16, #tpu.memory_space<vmem>>, vector<1x40x32xbf16>
    %57 = vector.shape_cast %56 : vector<1x40x32xbf16> to vector<40x32xbf16>
    %58 = vector.shape_cast %55 : vector<40x32xbf16> to vector<1x40x32xbf16>
    tpu.vector_store %arg6[%c0_50, %c0_51, %c0_52], %58 {strides = array<i32>} : memref<1x40x32xbf16, #tpu.memory_space<vmem>>, vector<1x40x32xbf16>,
    return
  }
  func.func @transform_0(%arg0: i32, %arg1: i32) -> (i32, i32, i32) {
    %c0_i32 = arith.constant 0 : i32
    %c0_i32_0 = arith.constant 0 : i32
    return %arg0, %arg1, %c0_i32 : i32, i32, i32
  }
  func.func @transform_1(%arg0: i32, %arg1: i32) -> (i32, i32, i32) {
    %c1_i32 = arith.constant 1 : i32
    %0 = arith.addi %arg1, %c1_i32 : i32
    %c1_i32_0 = arith.constant 1 : i32
    %1 = arith.muli %0, %c1_i32_0 : i32
    %c0_i32 = arith.constant 0 : i32
    %c0_i32_1 = arith.constant 0 : i32
    return %arg0, %1, %c0_i32 : i32, i32, i32
  }
  func.func @transform_2(%arg0: i32, %arg1: i32) -> (i32, i32, i32) {
    %c0_i32 = arith.constant 0 : i32
    %c0_i32_0 = arith.constant 0 : i32
    %c0_i32_1 = arith.constant 0 : i32
    %c0_i32_2 = arith.constant 0 : i32
    return %c0_i32, %c0_i32_0, %c0_i32_1 : i32, i32, i32
  }
  func.func @transform_3(%arg0: i32, %arg1: i32) -> (i32, i32) {
    %c0_i32 = arith.constant 0 : i32
    %c0_i32_0 = arith.constant 0 : i32
    %c0_i32_1 = arith.constant 0 : i32
    return %c0_i32, %c0_i32_0 : i32, i32
  }
  func.func @transform_4(%arg0: i32, %arg1: i32) -> (i32, i32, i32) {
    %c0_i32 = arith.constant 0 : i32
    %c0_i32_0 = arith.constant 0 : i32
    return %arg0, %arg1, %c0_i32 : i32, i32, i32
  }
}

</mosaic_0001>

<bundles_post_ra>
// kernel: _lambda_.1
= control target key start
LH: loop header
LB: loop body
LE: loop exit
PB: predicated region body
PF: predicated region fallthrough
CT: control target
= control target key end

     0   :  { %s1707_s15 = smov 0   ;;  %s1709_s16 = smov 0   ;;  %s1946_s0 = inlined_call_operand.vmem [shape: bf16[1,240,16], index: 0, kind: input, shape index: {}, may-alias: {0,1}]   ;;  %s1947_s1 = inlined_call_operand.vmem [shape: bf16[1,240,16], index: 1, kind: input, shape index: {}, may-alias: {0,1}]   ;;  %s1948_s2 = inlined_call_operand.vmem [shape: bf16[9,16,32], index: 2, kind: input, shape index: {}]   ;;  %s1949_s3 = inlined_call_operand.vmem [shape: f32[1,32], index: 3, kind: input, shape index: {}]   ;;  %s1950_s4 = inlined_call_operand.vmem [shape: bf16[1,200,32], index: 4, kind: output, shape index: {}]  }
   0x1   :  { %s1711_s17 = smov 0  }
   0x2 LB: > { %s23_s18 = sadd.s32 1, %s1674_s16  ;;  %p1352_p0 = scmp.ge.s32.totalorder %s1678_s17, 1  ;;  %s1678_s17 = sphi %s1711_s17, %s14_s17   ;;  %s1674_s16 = sphi %s1709_s16, %s1952_s16   ;;  %s1670_s15 = sphi %s1707_s15, %s1951_s15  }
   0x3   : > { %p24_p1 = scmp.ge.s32.totalorder %s23_s18, 5  ;;  %p204_p2 = scmp.lt.s32.totalorder %s1678_s17, 6 }
   0x5   : > { %s1954_s18 = smov (%p24_p1, %s23_s18), 0  ;;  %p205_p3 = pnand %p1352_p0, %p204_p2 }
   0x6   : > { %s1730_s21 = smul.u32 (!%p205_p3), 5, %s1670_s15  ;;  %s258_s22 = sadd.s32 (!%p205_p3), 1, %s1670_s15 }
   0x7   : > { %208 = sbr.rel (%p205_p3) target bundleno = 342 (0x156), region = 36 }
   0x8   : > { %s259_s23 = smul.u32 (!%p205_p3), 5, %s258_s22  ;;  %p251_p4 = scmp.lt.s32.totalorder (!%p205_p3), %s1730_s21, 29 }
   0x9   : > { %p273_p6 = scmp.lt.s32.totalorder (!%p205_p3), %s1730_s21, 24 }
   0xa   : > { %p262_p5 = scmp.lt.s32.totalorder (!%p205_p3), %s259_s23, 29 }
   0xc   : > { %v1630_v0 = vld [vmem:[%s1948_s2 + $0x8] sm:$0xff]   ;;  %v1680_v1 = vmov 0.0   ;;  %vm1681_vm0 = vmmov 0   ;;  %s252_s24 = scalar_select %p251_p4, %s1730_s21, 29  ;;  %vm286_vm1 = vcmask 125952   ;;  %vm358_vm3 = vcmask 130048  }
   0xd   : > { %1602 = vmatprep.subr.bf16.mxu1 %v1680_v1  ;;  %1476 = vmatprep.subr.bf16.mxu0 %v1680_v1  ;;  %s1956_s23 = smov (!%p262_p5, %s259_s23), 29  ;;  %vm328_vm2 = vsmask.f32 7424  ;;  %v1633_v28 = vld [vmem:[%s1948_s2] sm:$0xff]   ;;  %v1635_v32 = vld [vmem:[%s1948_s2 + $0x10] sm:$0xff]   ;;  %vm501_vm4 = vcmask 1046528  }
   0xe   : > { %1603 = vmatpush3.bf16.msra.mxu1 %v1630_v0  ;;  %1482 = vmatprep.mubr.msk.bf16.mxu1 %vm1681_vm0, %v1680_v1  ;;  %s1353_s25 = sshll.u32 %s252_s24, 2  ;;  %s1354_s29 = sshll.u32 %s1956_s23, 2  ;;  %v1638_v40 = vld [vmem:[%s1948_s2 + $0x20] sm:$0xff]   ;;  %v1637_v44 = vld [vmem:[%s1948_s2 + $0x18] sm:$0xff]   ;;  %v1643_v57 = vld [vmem:[%s1948_s2 + $0x30] sm:$0xff]   ;;  %vm1237_vm5 = vcmask 257024  }
   0xf   : > { %1490 = vmatprep.subr.bf16.mxu1 %v1680_v1  ;;  %1477 = vmatpush3.bf16.msra.mxu0 %v1630_v0  ;;  %s256_s28 = scalar_lea.vmem %s1946_s0, %s1353_s25  ;;  %s267_s6 = scalar_lea.vmem %s1947_s1, %s1354_s29  ;;  %v1642_v63 = vld [vmem:[%s1948_s2 + $0x28] sm:$0xff]  }
  0x10   : > { %1478 = vmatprep.mubr.msk.bf16.mxu0 %vm1681_vm0, %v1680_v1  ;;  %1504 = vmatprep.subr.bf16.mxu0 %v1680_v1  ;;  %v283_v2 = vld [vmem:[%s256_s28 + $0x8] sm:$0xf]  ;;  %v284_v3 = vld [vmem:[%s256_s28 + $0xc] sm:$0xf]  ;;  %v285_v4 = vld [vmem:[%s256_s28 + $0x10] sm:$0xf] }
  0x11   : > { %289 = vst.msk [vmem:[#allocation2 + $0x8] sm:$0xf] %vm286_vm1, %v283_v2  ;;  %290 = vst.msk [vmem:[#allocation2 + $0xc] sm:$0xf] %vm286_vm1, %v284_v3  ;;  %v292_v5 = vld [vmem:[%s267_s6] sm:$0xf] }
  0x12   : > { %291 = vst.msk [vmem:[#allocation2 + $0x10] sm:$0xf] %vm286_vm1, %v285_v4  ;;  %v281_v6 = vld [vmem:[%s256_s28] sm:$0xf]  ;;  %v282_v7 = vld [vmem:[%s256_s28 + $0x4] sm:$0xf] }
  0x13   : > { %297 = vst.msk [vmem:[#allocation2 + $0x14] sm:$0xf] %vm286_vm1, %v292_v5  ;;  %287 = vst.msk [vmem:[#allocation2] sm:$0xf] %vm286_vm1, %v281_v6  ;;  %v293_v8 = vld [vmem:[%s267_s6 + $0x4] sm:$0xf] }
  0x14   : > { %288 = vst.msk [vmem:[#allocation2 + $0x4] sm:$0xf] %vm286_vm1, %v282_v7  ;;  %v294_v9 = vld [vmem:[%s267_s6 + $0x8] sm:$0xf]  ;;  %298 = vst.msk [vmem:[#allocation2 + $0x18] sm:$0xf] %vm286_vm1, %v293_v8 }
  0x15   : > { %299 = vst.msk [vmem:[#allocation2 + $0x1c] sm:$0xf] %vm286_vm1, %v294_v9  ;;  %v295_v10 = vld [vmem:[%s267_s6 + $0xc] sm:$0xf]  ;;  %v296_v11 = vld [vmem:[%s267_s6 + $0x10] sm:$0xf] }
  0x16   : > { %300 = vst.msk [vmem:[#allocation2 + $0x20] sm:$0xf] %vm286_vm1, %v295_v10  ;;  %301 = vst.msk [vmem:[#allocation2 + $0x24] sm:$0xf] %vm286_vm1, %v296_v11  ;;  %v1649_v9 = vld [vmem:[%s1948_s2 + $0x40] sm:$0xff]   ;;  %s1958_s21 = smov (!%p273_p6, %s1730_s21), 24 }
  0x17   : > { %s1355_s29 = sshll.u32 %s1958_s21, 2 }
  0x18   : > { %v1631_v14 = vld [vmem:[#allocation2 + $0x8] sm:$0xff]   ;;  %s1922_s6 = scalar_lea.vmem %s1950_s4, %s1355_s29 }
  0x19   : > { %v1756_v12 = vld [vmem:[#allocation2 + $0x10] sm:$0xf]  ;;  %v337_v18 = vshll.u32 %v1631_v14, 16  ;;  %v341_v19 = vshrl.u32 %v1631_v14, 16  ;;  %v503_v37 = vrot.slane %v1631_v14, 1  ;;  %v1641_v62 = vld [vmem:[#allocation2 + $0x8] sm:$0xff]  }
  0x1a   : > { %v309_v13 = vld [vmem:[#allocation2 + $0x14] sm:$0x1]  ;;  %v302_v15 = vld [vmem:[#allocation2] sm:$0xf]  ;;  %v680_v42 = vld [vmem:[#allocation2 + $0x8] sm:$0xf]  ;;  %v1365_v55 = vcombine.low %v1756_v12, %v1756_v12 }
  0x1b   : > { %v1360_v16 = vcombine.low %v1756_v12, %v309_v13  ;;  %v303_v17 = vld [vmem:[#allocation2 + $0x4] sm:$0xf]  ;;  %v339_v22 = vrot.slane %v337_v18, 1  ;;  %v494_v25 = vld [vmem:[#allocation2] sm:$0xe]  ;;  %v1797_v47 = vld [vmem:[#allocation2 + $0x10] sm:$0xff]  }
  0x1c   : > { %v1358_v20 = vcombine.low %v302_v15, %v303_v17  ;;  %v1372_v33 = vcombine.low %v494_v25, %v303_v17  ;;  %v681_v43 = vld [vmem:[#allocation2 + $0xc] sm:$0xf]  ;;  %v712_v51 = vshll.u32 %v1797_v47, 16  ;;  %v1806_v54 = vld [vmem:[#allocation2 + $0x18] sm:$0x1f]   ;;  %v716_v58 = vshrl.u32 %v1797_v47, 16 }
  0x1d   : > { %v345_v21 = vshll.u32 %v1360_v16, 16  ;;  %v343_v27 = vor.u32 %v341_v19, %v339_v22  ;;  %v349_v34 = vshrl.u32 %v1360_v16, 16  ;;  %v505_v41 = vrot.slane %v1360_v16, 1  ;;  %v1645_v3 = vld [vmem:[#allocation2 + $0x10] sm:$0xff]   ;;  %v803_v5 = vld [vmem:[#allocation2 + $0x8] sm:$0xe] }
  0x1e   : > { %v330_v23 = vshrl.u32 %v1358_v20, 16  ;;  %v332_v24 = vshll.u32 %v1358_v20, 16  ;;  %v502_v36 = vrot.slane %v1372_v33, 1  ;;  %v1388_v46 = vcombine.low %v680_v42, %v681_v43  ;;  %v1646_v6 = vld [vmem:[#allocation2 + $0x18] ss:$0 sps:$4 sm:$0xff]   ;;  %v1647_v8 = vld [vmem:[#allocation2 + $0x10] sm:$0xff]  }
  0x1f   : > { %v347_v26 = vrot.slane %v345_v21, 1  ;;  %v506_v45 = vsel %vm501_vm4, %v503_v37, %v505_v41  ;;  %v714_v53 = vrot.slane %v712_v51, 1  ;;  %v720_v59 = vshll.u32 %v1806_v54, 16  ;;  %v1648_v13 = vld [vmem:[%s1948_s2 + $0x38] sm:$0xff]   ;;  %v988_v16 = vld [vmem:[#allocation2 + $0x10] sm:$0xf] }
  0x20   : > { %v334_v29 = vrot.slane %v332_v24, 1  ;;  %v504_v39 = vsel %vm501_vm4, %v502_v36, %v503_v37  ;;  %v707_v48 = vshll.u32 %v1388_v46, 16  ;;  %v705_v49 = vshrl.u32 %v1388_v46, 16  ;;  %v989_v17 = vld [vmem:[#allocation2 + $0x14] sm:$0xf] }
  0x21   : > { %v348_v30 = vsel %vm328_vm2, %v343_v27, %v347_v26  ;;  %v351_v38 = vor.u32 %v349_v34, %v347_v26  ;;  %v718_v60 = vor.u32 %v716_v58, %v714_v53  ;;  %v722_v61 = vrot.slane %v720_v59, 1  ;;  %v1111_v18 = vld [vmem:[#allocation2 + $0x10] sm:$0xe]  ;;  %v1651_v21 = vld [vmem:[#allocation2 + $0x20] ss:$0 sps:$4 sm:$0xff]  }
  0x22   : > { %v335_v31 = vor.u32 %v334_v29, %v330_v23  ;;  %1483 = vmatmul.mubr.msk.bf16.vlgmr.msra.gmra.mxu1 %vm358_vm3, %v348_v30  ;;  %v709_v50 = vrot.slane %v707_v48, 1  ;;  %v724_v2 = vshrl.u32 %v1806_v54, 16  ;;  %v1397_v7 = vcombine.low %v803_v5, %v681_v43 }
  0x23   : > { %1491 = vmatpush3.bf16.msra.mxu1 %v1633_v28  ;;  %1486 = vmatprep.mubr.msk.bf16.mxu1 %vm1681_vm0, %v1680_v1  ;;  %v723_v0 = vsel %vm328_vm2, %v718_v60, %v722_v61  ;;  %v811_v11 = vrot.slane %v1797_v47, 1  ;;  %v813_v15 = vrot.slane %v1806_v54, 1  ;;  %v1422_v23 = vcombine.low %v1111_v18, %v989_v17 }
  0x24   : > { %v340_v35 = vsel %vm328_vm2, %v335_v31, %v339_v22  ;;  %1518 = vmatprep.subr.bf16.mxu1 %v1680_v1  ;;  %v710_v52 = vor.u32 %v709_v50, %v705_v49  ;;  %v726_v4 = vor.u32 %v724_v2, %v722_v61  ;;  %v810_v10 = vrot.slane %v1397_v7, 1  ;;  %v1653_v22 = vld [vmem:[#allocation2 + $0x18] sm:$0xff]   ;;  %v1655_v31 = vld [vmem:[#allocation2 + $0x20] sm:$0x1f]  }
  0x25   : > { %1479 = vmatmul.mubr.msk.bf16.vlgmr.msra.gmra.mxu0 %vm358_vm3, %v340_v35  ;;  %v814_v19 = vsel %vm501_vm4, %v811_v11, %v813_v15  ;;  %v1118_v25 = vrot.slane %v1422_v23, 1  ;;  %v1119_v26 = vrot.slane %v1653_v22, 1  ;;  %v1020_v29 = vshll.u32 %v1653_v22, 16 }
  0x26   : > { %1505 = vmatpush3.bf16.msra.mxu0 %v1635_v32  ;;  %1506 = vmatprep.mubr.msk.bf16.mxu0 %vm1681_vm0, %v1680_v1  ;;  %v715_v56 = vsel %vm328_vm2, %v710_v52, %v714_v53  ;;  %v812_v12 = vsel %vm501_vm4, %v810_v10, %v811_v11  ;;  %v1121_v34 = vrot.slane %v1655_v31, 1  ;;  %v1024_v36 = vshrl.u32 %v1653_v22, 16 }
  0x27   : > { %1532 = vmatprep.subr.bf16.mxu0 %v1680_v1  ;;  %v1120_v30 = vsel %vm501_vm4, %v1118_v25, %v1119_v26  ;;  %v1022_v33 = vrot.slane %v1020_v29, 1  ;;  %v1028_v37 = vshll.u32 %v1655_v31, 16  ;;  %v1032_v42 = vshrl.u32 %v1655_v31, 16 }
  0x2a   : > { %1487 = vmatmul.mubr.msk.bf16.gmra.mxu1 %vm358_vm3, %v351_v38  ;;  %v1122_v38 = vsel %vm501_vm4, %v1119_v26, %v1121_v34 }
  0x2b   : > { %1492 = vmatprep.mubr.msk.bf16.mxu1 %vm1681_vm0, %v1680_v1 }
  0x2d   : > { %1507 = vmatmul.mubr.msk.bf16.vlgmr.msra.gmra.mxu0 %vm358_vm3, %v504_v39  ;;  %v1026_v39 = vor.u32 %v1024_v36, %v1022_v33 }
  0x2e   : > { %1533 = vmatpush3.bf16.msra.mxu0 %v1638_v40  ;;  %1510 = vmatprep.mubr.msk.bf16.mxu0 %vm1681_vm0, %v1680_v1  ;;  %v1030_v40 = vrot.slane %v1028_v37, 1 }
  0x2f   : > { %1560 = vmatprep.subr.bf16.mxu0 %v1680_v1 }
  0x30   : > { %v1034_v43 = vor.u32 %v1032_v42, %v1030_v40 }
  0x32   : > { %1493 = vmatmul.mubr.msk.bf16.vlgmr.msra.gmra.mxu1 %vm358_vm3, %v1358_v20  ;;  %v1413_v20 = vcombine.low %v988_v16, %v989_v17 }
  0x33   : > { %1519 = vmatpush3.bf16.msra.mxu1 %v1637_v44  ;;  %1496 = vmatprep.mubr.msk.bf16.mxu1 %vm1681_vm0, %v1680_v1 }
  0x34   : > { %1546 = vmatprep.subr.bf16.mxu1 %v1680_v1  ;;  %v1015_v24 = vshll.u32 %v1413_v20, 16  ;;  %v1013_v27 = vshrl.u32 %v1413_v20, 16 }
  0x35   : > { %1511 = vmatmul.mubr.msk.bf16.gmra.mxu0 %vm358_vm3, %v506_v45 }
  0x36   : > { %1514 = vmatprep.mubr.msk.bf16.mxu0 %vm1681_vm0, %v1680_v1  ;;  %v1017_v28 = vrot.slane %v1015_v24, 1 }
  0x38   : > { %v1018_v32 = vor.u32 %v1017_v28, %v1013_v27 }
  0x3a   : > { %1497 = vmatmul.mubr.msk.bf16.gmra.mxu1 %vm358_vm3, %v1631_v14  ;;  %v1650_v14 = vld [vmem:[#allocation2 + $0x18] sm:$0xff]   ;;  %v1023_v35 = vsel %vm328_vm2, %v1018_v32, %v1022_v33 }
  0x3b   : > { %1500 = vmatprep.mubr.msk.bf16.mxu1 %vm1681_vm0, %v1680_v1 }
  0x3d   : > { %1515 = vmatmul.mubr.msk.bf16.gmra.mxu0 %vm358_vm3, %v505_v41  ;;  %v1031_v41 = vsel %vm328_vm2, %v1026_v39, %v1030_v40 }
  0x3e   : > { %1534 = vmatprep.mubr.msk.bf16.mxu0 %vm1681_vm0, %v1680_v1 }
  0x42   : > { %1501 = vmatmul.mubr.msk.bf16.gmra.mxu1 %vm358_vm3, %v1365_v55 }
  0x43   : > { %1520 = vmatprep.mubr.msk.bf16.mxu1 %vm1681_vm0, %v1680_v1 }
  0x45   : > { %1535 = vmatmul.mubr.msk.bf16.vlgmr.msra.gmra.mxu0 %vm358_vm3, %v715_v56 }
  0x46   : > { %1561 = vmatpush3.bf16.msra.mxu0 %v1643_v57  ;;  %1538 = vmatprep.mubr.msk.bf16.mxu0 %vm1681_vm0, %v1680_v1 }
  0x47   : > { %1588 = vmatprep.subr.bf16.mxu0 %v1680_v1 }
  0x4a   : > { %1521 = vmatmul.mubr.msk.bf16.vlgmr.msra.gmra.mxu1 %vm358_vm3, %v1641_v62 }
  0x4b   : > { %1547 = vmatpush3.bf16.msra.mxu1 %v1642_v63  ;;  %1524 = vmatprep.mubr.msk.bf16.mxu1 %vm1681_vm0, %v1680_v1 }
  0x4c   : > { %1574 = vmatprep.subr.bf16.mxu1 %v1680_v1 }
  0x4d   : > { %1539 = vmatmul.mubr.msk.bf16.gmra.mxu0 %vm358_vm3, %v723_v0 }
  0x4e   : > { %1542 = vmatprep.mubr.msk.bf16.mxu0 %vm1681_vm0, %v1680_v1 }
  0x52   : > { %1525 = vmatmul.mubr.msk.bf16.gmra.mxu1 %vm358_vm3, %v1645_v3 }
  0x53   : > { %1528 = vmatprep.mubr.msk.bf16.mxu1 %vm1681_vm0, %v1680_v1 }
  0x55   : > { %1543 = vmatmul.mubr.msk.bf16.gmra.mxu0 %vm358_vm3, %v726_v4 }
  0x56   : > { %1562 = vmatprep.mubr.msk.bf16.mxu0 %vm1681_vm0, %v1680_v1 }
  0x5a   : > { %1529 = vmatmul.mubr.msk.bf16.gmra.mxu1 %vm358_vm3, %v1646_v6 }
  0x5b   : > { %1548 = vmatprep.mubr.msk.bf16.mxu1 %vm1681_vm0, %v1680_v1 }
  0x5d   : > { %1563 = vmatmul.mubr.msk.bf16.vlgmr.msra.gmra.mxu0 %vm358_vm3, %v1647_v8 }
  0x5e   : > { %1589 = vmatpush3.bf16.msra.mxu0 %v1649_v9  ;;  %1566 = vmatprep.mubr.msk.bf16.mxu0 %vm1681_vm0, %v1680_v1 }
  0x62   : > { %1549 = vmatmul.mubr.msk.bf16.vlgmr.msra.gmra.mxu1 %vm358_vm3, %v812_v12 }
  0x63   : > { %1575 = vmatpush3.bf16.msra.mxu1 %v1648_v13  ;;  %1552 = vmatprep.mubr.msk.bf16.mxu1 %vm1681_vm0, %v1680_v1 }
  0x65   : > { %1567 = vmatmul.mubr.msk.bf16.gmra.mxu0 %vm358_vm3, %v1650_v14 }
  0x66   : > { %1570 = vmatprep.mubr.msk.bf16.mxu0 %vm1681_vm0, %v1680_v1 }
  0x6a   : > { %1553 = vmatmul.mubr.msk.bf16.gmra.mxu1 %vm358_vm3, %v814_v19 }
  0x6b   : > { %1556 = vmatprep.mubr.msk.bf16.mxu1 %vm1681_vm0, %v1680_v1 }
  0x6d   : > { %1571 = vmatmul.mubr.msk.bf16.gmra.mxu0 %vm358_vm3, %v1651_v21 }
  0x6e   : > { %1590 = vmatprep.mubr.msk.bf16.mxu0 %vm1681_vm0, %v1680_v1 }
  0x72   : > { %1557 = vmatmul.mubr.msk.bf16.gmra.mxu1 %vm358_vm3, %v813_v15 }
  0x73   : > { %1576 = vmatprep.mubr.msk.bf16.mxu1 %vm1681_vm0, %v1680_v1 }
  0x75   : > { %1591 = vmatmul.mubr.msk.bf16.vlgmr.msra.gmra.mxu0 %vm358_vm3, %v1120_v30 }
  0x76   : > { %1594 = vmatprep.mubr.msk.bf16.mxu0 %vm1681_vm0, %v1680_v1 }
  0x7a   : > { %1577 = vmatmul.mubr.msk.bf16.vlgmr.msra.gmra.mxu1 %vm358_vm3, %v1023_v35 }
  0x7b   : > { %1580 = vmatprep.mubr.msk.bf16.mxu1 %vm1681_vm0, %v1680_v1 }
  0x7d   : > { %1595 = vmatmul.mubr.msk.bf16.gmra.mxu0 %vm358_vm3, %v1122_v38 }
  0x7e   : > { %1598 = vmatprep.mubr.msk.bf16.mxu0 %vm1681_vm0, %v1680_v1 }
  0x82   : > { %1581 = vmatmul.mubr.msk.bf16.gmra.mxu1 %vm358_vm3, %v1031_v41 }
  0x83   : > { %1584 = vmatprep.mubr.msk.bf16.mxu1 %vm1681_vm0, %v1680_v1 }
  0x85   : > { %1599 = vmatmul.mubr.msk.bf16.gmra.mxu0 %vm358_vm3, %v1121_v34 }
  0x8a   : > { %1585 = vmatmul.mubr.msk.bf16.gmra.mxu1 %vm358_vm3, %v1034_v43 }
  0xe2   : > { %v410_v44 = vpop.f32.mrf.mxu1 }
  0xe4   : > { %v1484_v45 = vpop.f32.mrf.mxu1 }
  0xe5   : > { %v402_v46 = vpop.f32.mrf.mxu0 }
  0xe6   : > { %v413_v47 = vpop.f32.mrf.mxu1 }
  0xe7   : > { %v1480_v48 = vpop.f32.mrf.mxu0 }
  0xe8   : > { %v1485_v49 = vpop.f32.mrf.mxu1 }
  0xe9   : > { %v405_v50 = vpop.f32.mrf.mxu0 }
  0xea   : > { %v418_v51 = vpop.f32.mrf.mxu1 }
  0xeb   : > { %v1481_v52 = vpop.f32.mrf.mxu0 }
  0xec   : > { %v1488_v53 = vpop.f32.mrf.mxu1 }
  0xed   : > { %v556_v54 = vpop.f32.mrf.mxu0 }
  0xee   : > { %v421_v55 = vpop.f32.mrf.mxu1 }
  0xef   : > { %v1508_v56 = vpop.f32.mrf.mxu0 }
  0xf0   : > { %v1489_v57 = vpop.f32.mrf.mxu1 }
  0xf1   : > { %v559_v1 = vpop.f32.mrf.mxu0 }
  0xf2   : > { %v472_v58 = vpop.f32.mrf.mxu1 }
  0xf3   : > { %v1509_v59 = vpop.f32.mrf.mxu0  ;;  %v473_v60 = vadd.f32 %v472_v58, %v402_v46 }
  0xf4   : > { %v1494_v61 = vpop.f32.mrf.mxu1 }
  0xf5   : > { %v564_v62 = vpop.f32.mrf.mxu0  ;;  %v1890_v63 = vadd.f32 %v556_v54, %v473_v60 }
  0xf6   : > { %v475_v0 = vpop.f32.mrf.mxu1 }
  0xf7   : > { %v1512_v2 = vpop.f32.mrf.mxu0  ;;  %v476_v3 = vadd.f32 %v475_v0, %v405_v50 }
  0xf8   : > { %v1495_v4 = vpop.f32.mrf.mxu1 }
  0xf9   : > { %v567_v5 = vpop.f32.mrf.mxu0  ;;  %v1892_v6 = vadd.f32 %v559_v1, %v476_v3 }
  0xfa   : > { %v480_v7 = vpop.f32.mrf.mxu1 }
  0xfb   : > { %v1513_v8 = vpop.f32.mrf.mxu0  ;;  %v481_v9 = vadd.f32 %v480_v7, %v410_v44 }
  0xfc   : > { %v1498_v10 = vpop.f32.mrf.mxu1 }
  0xfd   : > { %v572_v11 = vpop.f32.mrf.mxu0  ;;  %v1894_v12 = vadd.f32 %v564_v62, %v481_v9 }
  0xfe   : > { %v483_v13 = vpop.f32.mrf.mxu1 }
  0xff   : > { %v1516_v14 = vpop.f32.mrf.mxu0  ;;  %v484_v15 = vadd.f32 %v483_v13, %v413_v47 }
 0x100   : > { %v1499_v16 = vpop.f32.mrf.mxu1 }
 0x101   : > { %v575_v17 = vpop.f32.mrf.mxu0  ;;  %v1896_v18 = vadd.f32 %v567_v5, %v484_v15 }
 0x102   : > { %v488_v19 = vpop.f32.mrf.mxu1 }
 0x103   : > { %v1517_v20 = vpop.f32.mrf.mxu0  ;;  %v489_v21 = vadd.f32 %v488_v19, %v418_v51 }
 0x104   : > { %v1502_v22 = vpop.f32.mrf.mxu1 }
 0x105   : > { %v776_v23 = vpop.f32.mrf.mxu0  ;;  %v1898_v24 = vadd.f32 %v572_v11, %v489_v21 }
 0x106   : > { %v491_v25 = vpop.f32.mrf.mxu1 }
 0x107   : > { %v1536_v26 = vpop.f32.mrf.mxu0 }
 0x108   : > { %v1503_v27 = vpop.f32.mrf.mxu1 }
 0x109   : > { %v779_v28 = vpop.f32.mrf.mxu0 }
 0x10a   : > { %v653_v29 = vpop.f32.mrf.mxu1 }
 0x10b   : > { %v1537_v30 = vpop.f32.mrf.mxu0  ;;  %v675_v4 = vadd.f32 %v653_v29, %v1890_v63 }
 0x10c   : > { %v1522_v31 = vpop.f32.mrf.mxu1  ;;  %v1427_v30 = vld [vmem:[%s1949_s3] ss:$0 sm:$0xff] }
 0x10d   : > { %v784_v32 = vpop.f32.mrf.mxu0  ;;  %v798_v11 = vadd.f32 %v776_v23, %v675_v4 }
 0x10e   : > { %v656_v33 = vpop.f32.mrf.mxu1 }
 0x10f   : > { %v1540_v34 = vpop.f32.mrf.mxu0  ;;  %v676_v10 = vadd.f32 %v656_v33, %v1892_v6 }
 0x110   : > { %v1523_v35 = vpop.f32.mrf.mxu1 }
 0x111   : > { %v1900_v36 = vpop.f32.mrf.mxu0  ;;  %v799_v20 = vadd.f32 %v779_v28, %v676_v10 }
 0x112   : > { %v661_v37 = vpop.f32.mrf.mxu1 }
 0x113   : > { %v1541_v38 = vpop.f32.mrf.mxu0  ;;  %v677_v19 = vadd.f32 %v661_v37, %v1894_v12 }
 0x114   : > { %v1526_v39 = vpop.f32.mrf.mxu1 }
 0x115   : > { %v1902_v40 = vpop.f32.mrf.mxu0  ;;  %v800_v6 = vadd.f32 %v784_v32, %v677_v19 }
 0x116   : > { %v664_v41 = vpop.f32.mrf.mxu1 }
 0x117   : > { %v1544_v42 = vpop.f32.mrf.mxu0  ;;  %v678_v29 = vadd.f32 %v664_v41, %v1896_v18 }
 0x118   : > { %v1527_v43 = vpop.f32.mrf.mxu1 }
 0x119   : > { %v795_v44 = vpop.f32.mrf.mxu0  ;;  %v801_v39 = vadd.f32 %v1900_v36, %v678_v29 }
 0x11a   : > { %v669_v45 = vpop.f32.mrf.mxu1 }
 0x11b   : > { %v1545_v46 = vpop.f32.mrf.mxu0  ;;  %v679_v38 = vadd.f32 %v669_v45, %v1898_v24 }
 0x11c   : > { %v1530_v47 = vpop.f32.mrf.mxu1 }
 0x11d   : > { %v961_v48 = vpop.f32.mrf.mxu0  ;;  %v802_v36 = vadd.f32 %v1902_v40, %v679_v38 }
 0x11e   : > { %v672_v49 = vpop.f32.mrf.mxu1 }
 0x11f   : > { %v1564_v50 = vpop.f32.mrf.mxu0 }
 0x120   : > { %v1531_v51 = vpop.f32.mrf.mxu1 }
 0x121   : > { %v964_v52 = vpop.f32.mrf.mxu0 }
 0x122   : > { %v864_v53 = vpop.f32.mrf.mxu1 }
 0x123   : > { %v1565_v54 = vpop.f32.mrf.mxu0  ;;  %v886_v15 = vadd.f32 %v864_v53, %v798_v11 }
 0x124   : > { %v1550_v55 = vpop.f32.mrf.mxu1 }
 0x125   : > { %v969_v56 = vpop.f32.mrf.mxu0  ;;  %v983_v25 = vadd.f32 %v961_v48, %v886_v15 }
 0x126   : > { %v867_v57 = vpop.f32.mrf.mxu1 }
 0x127   : > { %v1568_v1 = vpop.f32.mrf.mxu0  ;;  %v887_v63 = vadd.f32 %v867_v57, %v799_v20 }
 0x128   : > { %v1551_v58 = vpop.f32.mrf.mxu1 }
 0x129   : > { %v1904_v59 = vpop.f32.mrf.mxu0  ;;  %v984_v34 = vadd.f32 %v964_v52, %v887_v63 }
 0x12a   : > { %v872_v60 = vpop.f32.mrf.mxu1 }
 0x12b   : > { %v1569_v61 = vpop.f32.mrf.mxu0  ;;  %v888_v12 = vadd.f32 %v872_v60, %v800_v6 }
 0x12c   : > { %v1554_v62 = vpop.f32.mrf.mxu1 }
 0x12d   : > { %v1906_v0 = vpop.f32.mrf.mxu0  ;;  %v985_v47 = vadd.f32 %v969_v56, %v888_v12 }
 0x12e   : > { %v875_v2 = vpop.f32.mrf.mxu1 }
 0x12f   : > { %v1572_v3 = vpop.f32.mrf.mxu0  ;;  %v889_v43 = vadd.f32 %v875_v2, %v801_v39 }
 0x130   : > { %v1555_v5 = vpop.f32.mrf.mxu1 }
 0x131   : > { %v980_v7 = vpop.f32.mrf.mxu0  ;;  %v986_v56 = vadd.f32 %v1904_v59, %v889_v43 }
 0x132   : > { %v880_v8 = vpop.f32.mrf.mxu1 }
 0x133   : > { %v1573_v9 = vpop.f32.mrf.mxu0  ;;  %v890_v53 = vadd.f32 %v880_v8, %v802_v36 }
 0x134   : > { %v1558_v13 = vpop.f32.mrf.mxu1 }
 0x135   : > { %v1172_v14 = vpop.f32.mrf.mxu0  ;;  %v987_v4 = vadd.f32 %v1906_v0, %v890_v53 }
 0x136   : > { %v883_v16 = vpop.f32.mrf.mxu1 }
 0x137   : > { %v1592_v17 = vpop.f32.mrf.mxu0 }
 0x138   : > { %v1559_v21 = vpop.f32.mrf.mxu1 }
 0x139   : > { %v1175_v22 = vpop.f32.mrf.mxu0 }
 0x13a   : > { %v1084_v26 = vpop.f32.mrf.mxu1 }
 0x13b   : > { %v1593_v27 = vpop.f32.mrf.mxu0  ;;  %v1106_v23 = vadd.f32 %v1084_v26, %v983_v25 }
 0x13c   : > { %v1578_v31 = vpop.f32.mrf.mxu1 }
 0x13d   : > { %v1180_v33 = vpop.f32.mrf.mxu0  ;;  %v1194_v28 = vadd.f32 %v1172_v14, %v1106_v23 }
 0x13e   : > { %v1087_v35 = vpop.f32.mrf.mxu1 }
 0x13f   : > { %v1596_v37 = vpop.f32.mrf.mxu0  ;;  %v1206_v18 = vadd.f32 %v1427_v30, %v1194_v28  ;;  %v1107_v32 = vadd.f32 %v1087_v35, %v984_v34 }
 0x140   : > { %v1579_v41 = vpop.f32.mrf.mxu1 }
 0x141   : > { %v1183_v42 = vpop.f32.mrf.mxu0  ;;  %v1211_v44 = vmax.f32 %v1206_v18, 0.0  ;;  %v1195_v46 = vadd.f32 %v1175_v22, %v1107_v32 }
 0x142   : > { %v1092_v48 = vpop.f32.mrf.mxu1 }
 0x143   : > { %v1597_v24 = vpop.f32.mrf.mxu0  ;;  %v1435_v45 = vpack.c.bf16 %v1211_v44, %v1211_v44  ;;  %v1207_v49 = vadd.f32 %v1427_v30, %v1195_v46  ;;  %v1108_v50 = vadd.f32 %v1092_v48, %v985_v47 }
 0x144   : > { %v1582_v51 = vpop.f32.mrf.mxu1 }
 0x145   : > { %v1188_v52 = vpop.f32.mrf.mxu0  ;;  %1238 = vst.msk [vmem:[%s1922_s6] sm:$0xf] %vm1237_vm5, %v1435_v45  ;;  %v1212_v54 = vmax.f32 %v1207_v49, 0.0  ;;  %v1196_v55 = vadd.f32 %v1180_v33, %v1108_v50 }
 0x146   : > { %v1095_v57 = vpop.f32.mrf.mxu1 }
 0x147   : > { %v1600_v1 = vpop.f32.mrf.mxu0  ;;  %v1436_v58 = vpack.c.bf16 %v1212_v54, %v1212_v54  ;;  %v1208_v60 = vadd.f32 %v1427_v30, %v1196_v55  ;;  %v1109_v61 = vadd.f32 %v1095_v57, %v986_v56 }
 0x148   : > { %v1583_v40 = vpop.f32.mrf.mxu1 }
 0x149   : > { %v1191_v62 = vpop.f32.mrf.mxu0  ;;  %1239 = vst.msk [vmem:[%s1922_s6 + $0x4] sm:$0xf] %vm1237_vm5, %v1436_v58  ;;  %v1213_v2 = vmax.f32 %v1208_v60, 0.0  ;;  %v1197_v3 = vadd.f32 %v1183_v42, %v1109_v61 }
 0x14a   : > { %v1100_v5 = vpop.f32.mrf.mxu1 }
 0x14b   : > { %v1601_v7 = vpop.f32.mrf.mxu0  ;;  %v1437_v8 = vpack.c.bf16 %v1213_v2, %v1213_v2  ;;  %v1209_v59 = vadd.f32 %v1427_v30, %v1197_v3  ;;  %v1110_v9 = vadd.f32 %v1100_v5, %v987_v4 }
 0x14c   : > { %v1586_v10 = vpop.f32.mrf.mxu1 }
 0x14d   : > { %1240 = vst.msk [vmem:[%s1922_s6 + $0x8] sm:$0xf] %vm1237_vm5, %v1437_v8  ;;  %v1214_v11 = vmax.f32 %v1209_v59, 0.0  ;;  %v1198_v13 = vadd.f32 %v1188_v52, %v1110_v9 }
 0x14e   : > { %v1103_v14 = vpop.f32.mrf.mxu1 }
 0x14f   : > { %v1438_v15 = vpack.c.bf16 %v1214_v11, %v1214_v11  ;;  %v1210_v16 = vadd.f32 %v1427_v30, %v1198_v13 }
 0x150   : > { %v1587_v17 = vpop.f32.mrf.mxu1 }
 0x151   : > { %1241 = vst.msk [vmem:[%s1922_s6 + $0xc] sm:$0xf] %vm1237_vm5, %v1438_v15  ;;  %v1215_v19 = vmax.f32 %v1210_v16, 0.0 }
 0x153   : > { %v1439_v20 = vpack.c.bf16 %v1215_v19, %v1215_v19 }
 0x155   : > { %1242 = vst.msk [vmem:[%s1922_s6 + $0x10] sm:$0xf] %vm1237_vm5, %v1439_v20 }
 0x156 PF: > { %s14_s17 = sadd.s32 1, %s1678_s17   ;;  %s1951_s15 = smov %s1674_s16 }
 0x157   : > { %p11_p7 = scmp.ge.s32.totalorder %s14_s17, 7   ;;  %s1952_s16 = smov %s1954_s18 }
 0x159   :  { %13 = sbr.rel (!%p11_p7) target bundleno = 2 (0x2), region = 77 }

</bundles_post_ra>
